<compile_context>
chip_gen: v7x
topology: tpu7x:2x2x1
jax: 0.10.0
libtpu: 0.0.40
codegen_flags: <defaults>
</compile_context>

<pallas_src>
import jax
import jax.numpy as jnp
from jax.experimental import pallas as pl
from jax.experimental.pallas import tpu as pltpu


def _round_up(n, m):
    return ((n + m - 1) // m) * m


def _mlp_value_kernel(xt_ref, w1t_ref, b1_ref, w2_ref, b2_ref, o_ref):
    # Layer 1 on the MXU: (H_pad, D_pad) @ (D_pad, TB) -> (H_pad, TB), f32 accumulate.
    h = jnp.dot(w1t_ref[...], xt_ref[...], preferred_element_type=jnp.float32)
    # Bias + ReLU on the VPU (activations stay f32; bf16 only on matmul operands).
    h = jnp.maximum(h + b1_ref[...], 0.0)
    # Layer 2 (output width 1): elementwise multiply (VALU) + sublane reduce (XLU)
    # instead of an N=1 matmul -> already a lane-dense (1, TB) row.
    v = jnp.sum(h * w2_ref[...], axis=0, keepdims=True)
    o_ref[...] = (v + b2_ref[...]).astype(o_ref.dtype)


def unified_value_network(x, w1, b1, w2, b2, *, block_b=512,
                          weight_dtype=jnp.bfloat16):
    """Forward of UnifiedValueNetwork: relu(x @ W1 + b1) @ W2 + b2.

    x: (B, input_size) f32; w1: (input_size, H); b1: (H,)/(1, H);
    w2: (H, 1)/(H,); b2: scalar/(1,)/(1, 1).  Returns (B, 1) f32.
    """
    x = jnp.asarray(x, jnp.float32)
    B, D = x.shape
    H = w1.shape[1]

    # Pad feature dims to full 128-lane tiles; batch tile to a multiple of 128 so the
    # x tiles are aligned and the output slab store is lane-dense.
    D_pad = _round_up(D, 128)
    H_pad = _round_up(H, 128)
    TB = min(_round_up(block_b, 128), _round_up(B, 128))
    B_pad = _round_up(B, TB)
    grid = (B_pad // TB,)

    # Transposed + zero-padded operands (zero padding keeps results exact: padded
    # features contribute 0, padded hidden units have zero weight/bias/w2).
    xt = jnp.zeros((D_pad, B_pad), weight_dtype).at[:D, :B].set(
        x.T.astype(weight_dtype))
    w1t = jnp.zeros((H_pad, D_pad), weight_dtype).at[:H, :D].set(
        jnp.asarray(w1).T.astype(weight_dtype))
    b1c = jnp.zeros((H_pad, 1), jnp.float32).at[:H, 0].set(
        jnp.reshape(jnp.asarray(b1, jnp.float32), (H,)))
    w2c = jnp.zeros((H_pad, 1), jnp.float32).at[:H, 0].set(
        jnp.reshape(jnp.asarray(w2, jnp.float32), (H,)))
    b2c = jnp.reshape(jnp.asarray(b2, jnp.float32), (1, 1))

    itemsize_w = jnp.dtype(weight_dtype).itemsize
    # VMEM budget: resident W1^T + bias/w2 vectors + double-buffered x/out tiles
    # + live (H_pad, TB) activations; 2x headroom, clamped to [32 MiB, 64 MiB] so it
    # is valid on v7x (64 MiB physical) and a harmless no-op for tiny problems.
    vmem_need = (H_pad * D_pad * itemsize_w
                 + (2 * H_pad + 1) * 4
                 + 2 * D_pad * TB * itemsize_w
                 + 2 * TB * 4
                 + 2 * H_pad * TB * 4)
    vmem_limit = int(min(max(2 * vmem_need, 32 * 1024 * 1024), 64 * 1024 * 1024))

    bytes_accessed = (xt.size * itemsize_w + w1t.size * itemsize_w
                      + (b1c.size + w2c.size + b2c.size) * 4 + B_pad * 4)
    cost = pl.CostEstimate(
        flops=2 * B_pad * D_pad * H_pad + 3 * B_pad * H_pad,
        transcendentals=0,
        bytes_accessed=int(bytes_accessed))

    out = pl.pallas_call(
        _mlp_value_kernel,
        out_shape=jax.ShapeDtypeStruct((1, B_pad), jnp.float32),
        grid_spec=pltpu.PrefetchScalarGridSpec(
            num_scalar_prefetch=0,
            grid=grid,
            in_specs=[
                pl.BlockSpec((D_pad, TB), lambda i: (0, i)),     # x^T   : streamed
                pl.BlockSpec((H_pad, D_pad), lambda i: (0, 0)),  # W1^T  : resident
                pl.BlockSpec((H_pad, 1), lambda i: (0, 0)),      # b1    : resident
                pl.BlockSpec((H_pad, 1), lambda i: (0, 0)),      # w2    : resident
                pl.BlockSpec((1, 1), lambda i: (0, 0)),          # b2    : resident
            ],
            out_specs=pl.BlockSpec((1, TB), lambda i: (0, i)),   # lane-dense slab
        ),
        compiler_params=pltpu.CompilerParams(
            dimension_semantics=("parallel",),
            vmem_limit_bytes=vmem_limit),
        cost_estimate=cost,
    )(xt, w1t, b1c, w2c, b2c)

    # Drop batch padding and restore the (B, 1) PyTorch output shape.
    return out[0, :B].reshape(B, 1)


def init_params(key, input_size, hidden_size):
    """Deterministic init mimicking PyTorch nn.Linear default (uniform(-1/sqrt(fan_in)))."""
    k1, k2, k3, k4 = jax.random.split(key, 4)
    bound1 = 1.0 / jnp.sqrt(jnp.float32(input_size))
    bound2 = 1.0 / jnp.sqrt(jnp.float32(hidden_size))
    w1 = jax.random.uniform(k1, (input_size, hidden_size), jnp.float32, -bound1, bound1)
    b1 = jax.random.uniform(k2, (1, hidden_size), jnp.float32, -bound1, bound1)
    w2 = jax.random.uniform(k3, (hidden_size, 1), jnp.float32, -bound2, bound2)
    b2 = jax.random.uniform(k4, (1, 1), jnp.float32, -bound2, bound2)
    return w1, b1, w2, b2


if __name__ == "__main__":
    batch, input_size, hidden_size = 8, 16, 32

    key = jax.random.PRNGKey(0)
    kx, kp = jax.random.split(key)
    x = jax.random.normal(kx, (batch, input_size), jnp.float32)
    w1, b1, w2, b2 = init_params(kp, input_size, hidden_size)

    out = unified_value_network(x, w1, b1, w2, b2)
    out = jax.block_until_ready(out)

    # Reference in plain JAX with the same bf16 matmul operands / f32 accumulation.
    xb = x.astype(jnp.bfloat16).astype(jnp.float32)
    w1b = w1.astype(jnp.bfloat16).astype(jnp.float32)
    ref = jnp.maximum(xb @ w1b + b1, 0.0) @ w2 + b2

    assert out.shape == (batch, 1)
    assert jnp.allclose(out, ref, atol=2e-3, rtol=2e-3)

    print("KERNEL_OK")
</pallas_src>

<mosaic_0001>
module attributes {stable_mosaic.version = 11 : i64} {
  func.func @_mlp_value_kernel(%arg0: i32, %arg1: memref<128x128xbf16, #tpu.memory_space<vmem>>, %arg2: memref<128x128xbf16, #tpu.memory_space<vmem>>, %arg3: memref<128x1xf32, #tpu.memory_space<vmem>>, %arg4: memref<128x1xf32, #tpu.memory_space<vmem>>, %arg5: memref<1x1xf32, #tpu.memory_space<vmem>>, %arg6: memref<1x128xf32, #tpu.memory_space<vmem>>) attributes {dimension_semantics = [#tpu.dimension_semantics<parallel>], iteration_bounds = array<i64: 1>, scalar_prefetch = 0 : i64, scratch_operands = 0 : i64, tpu.core_type = #tpu.core_type<tc>, window_params = [{transform_indices = @transform_0, window_bounds = array<i64: 128, 128>}, {pipeline_mode = #tpu.pipeline_mode<synchronous>, transform_indices = @transform_1, window_bounds = array<i64: 128, 128>}, {pipeline_mode = #tpu.pipeline_mode<synchronous>, transform_indices = @transform_2, window_bounds = array<i64: 128, 1>}, {pipeline_mode = #tpu.pipeline_mode<synchronous>, transform_indices = @transform_3, window_bounds = array<i64: 128, 1>}, {pipeline_mode = #tpu.pipeline_mode<synchronous>, transform_indices = @transform_4, window_bounds = array<i64: 1, 1>}, {transform_indices = @transform_5, window_bounds = array<i64: 1, 128>}]} {
    %c0 = arith.constant 0 : index
    %c0_0 = arith.constant 0 : index
    %0 = vector.load %arg2[%c0, %c0_0] : memref<128x128xbf16, #tpu.memory_space<vmem>>, vector<128x128xbf16>
    %c0_1 = arith.constant 0 : index
    %c0_2 = arith.constant 0 : index
    %1 = vector.load %arg1[%c0_1, %c0_2] : memref<128x128xbf16, #tpu.memory_space<vmem>>, vector<128x128xbf16>
    %cst = arith.constant dense<0.000000e+00> : vector<128x128xf32>
    %2 = tpu.matmul %0, %1, %cst {dimension_numbers = #tpu.dot_dimension_numbers<[1], [0], [0], [1], [0, 0, 1, 1], [], []>} : vector<128x128xbf16>, vector<128x128xbf16>, vector<128x128xf32> -> vector<128x128xf32>
    %c0_3 = arith.constant 0 : index
    %c0_4 = arith.constant 0 : index
    %3 = vector.load %arg3[%c0_3, %c0_4] : memref<128x1xf32, #tpu.memory_space<vmem>>, vector<128x1xf32>
    %4 = vector.broadcast %3 : vector<128x1xf32> to vector<128x128xf32>
    %5 = arith.addf %2, %4 : vector<128x128xf32>
    %cst_5 = arith.constant 0.000000e+00 : f32
    %6 = vector.broadcast %cst_5 : f32 to vector<128x128xf32>
    %7 = arith.maximumf %5, %6 : vector<128x128xf32>
    %c0_6 = arith.constant 0 : index
    %c0_7 = arith.constant 0 : index
    %8 = vector.load %arg4[%c0_6, %c0_7] : memref<128x1xf32, #tpu.memory_space<vmem>>, vector<128x1xf32>
    %9 = vector.broadcast %8 : vector<128x1xf32> to vector<128x128xf32>
    %10 = arith.mulf %7, %9 : vector<128x128xf32>
    %cst_8 = arith.constant dense<0.000000e+00> : vector<128xf32>
    %11 = vector.multi_reduction <add>, %10, %cst_8 [0] : vector<128x128xf32> to vector<128xf32>
    %12 = vector.shape_cast %11 : vector<128xf32> to vector<1x128xf32>
    %c0_9 = arith.constant 0 : index
    %c0_10 = arith.constant 0 : index
    %13 = vector.load %arg5[%c0_9, %c0_10] : memref<1x1xf32, #tpu.memory_space<vmem>>, vector<1x1xf32>
    %14 = vector.broadcast %13 : vector<1x1xf32> to vector<1x128xf32>
    %15 = arith.addf %12, %14 : vector<1x128xf32>
    %c0_11 = arith.constant 0 : index
    %c0_12 = arith.constant 0 : index
    %16 = vector.load %arg6[%c0_11, %c0_12] : memref<1x128xf32, #tpu.memory_space<vmem>>, vector<1x128xf32>
    tpu.vector_store %arg6[%c0_11, %c0_12], %15 {strides = array<i32>} : memref<1x128xf32, #tpu.memory_space<vmem>>, vector<1x128xf32>,
    return
  }
  func.func @transform_0(%arg0: i32) -> (i32, i32) {
    %c0_i32 = arith.constant 0 : i32
    %c0_i32_0 = arith.constant 0 : i32
    return %c0_i32, %arg0 : i32, i32
  }
  func.func @transform_1(%arg0: i32) -> (i32, i32) {
    %c0_i32 = arith.constant 0 : i32
    %c0_i32_0 = arith.constant 0 : i32
    %c0_i32_1 = arith.constant 0 : i32
    return %c0_i32, %c0_i32_0 : i32, i32
  }
  func.func @transform_2(%arg0: i32) -> (i32, i32) {
    %c0_i32 = arith.constant 0 : i32
    %c0_i32_0 = arith.constant 0 : i32
    %c0_i32_1 = arith.constant 0 : i32
    return %c0_i32, %c0_i32_0 : i32, i32
  }
  func.func @transform_3(%arg0: i32) -> (i32, i32) {
    %c0_i32 = arith.constant 0 : i32
    %c0_i32_0 = arith.constant 0 : i32
    %c0_i32_1 = arith.constant 0 : i32
    return %c0_i32, %c0_i32_0 : i32, i32
  }
  func.func @transform_4(%arg0: i32) -> (i32, i32) {
    %c0_i32 = arith.constant 0 : i32
    %c0_i32_0 = arith.constant 0 : i32
    %c0_i32_1 = arith.constant 0 : i32
    return %c0_i32, %c0_i32_0 : i32, i32
  }
  func.func @transform_5(%arg0: i32) -> (i32, i32) {
    %c0_i32 = arith.constant 0 : i32
    %c0_i32_0 = arith.constant 0 : i32
    return %c0_i32, %arg0 : i32, i32
  }
}

</mosaic_0001>

<bundles_post_ra>
// kernel: tpu_custom_call.1
= control target key start
LH: loop header
LB: loop body
LE: loop exit
PB: predicated region body
PF: predicated region fallthrough
CT: control target
= control target key end

     0   :  { %s838_s0 = inlined_call_operand.vmem [shape: bf16[128,128], index: 0, kind: input, shape index: {}]   ;;  %s839_s1 = inlined_call_operand.vmem [shape: bf16[128,128], index: 1, kind: input, shape index: {}]   ;;  %s840_s2 = inlined_call_operand.vmem [shape: f32[128,1], index: 2, kind: input, shape index: {}]   ;;  %s841_s3 = inlined_call_operand.vmem [shape: f32[128,1], index: 3, kind: input, shape index: {}]   ;;  %s842_s4 = inlined_call_operand.<no memory space> [shape: f32[1,1], index: 4, kind: input, shape index: {}]   ;;  %s843_s5 = inlined_call_operand.hbm [shape: f32[1,128], index: 5, kind: output, shape index: {}]  }
   0x1   :  { %v10_v0 = vstv %s842_s4 }
   0x2   :  { %11 = vst [vmem:[#allocation2] sm:$0x1] %v10_v0 }
   0x3   :  { %v604_v1 = vld [vmem:[%s838_s0] sm:$0xff]   ;;  %v605_v2 = vld [vmem:[%s838_s0 + $0x8] sm:$0xff]   ;;  %v644_v3 = vmov 0   ;;  %v606_v4 = vld [vmem:[%s838_s0 + $0x10] sm:$0xff]  }
   0x4   :  { %602 = vset.pattern.permute.xlu0 %v644_v3  ;;  %603 = vset.pattern.permute.xlu1 %v644_v3  ;;  %v56_v5 = vld [vmem:[%s840_s2] sm:$0xff]  ;;  %v607_v6 = vld [vmem:[%s838_s0 + $0x18] sm:$0xff]   ;;  %v57_v7 = vld [vmem:[%s840_s2 + $0x8] sm:$0xff] }
   0x5   :  { %552 = vmatprep.subr.bf16.mxu0 %v604_v1  ;;  %584 = vmatprep.subr.bf16.mxu1 %v604_v1  ;;  %v58_v8 = vld [vmem:[%s840_s2 + $0x10] sm:$0xff]  ;;  %v612_v9 = vld [vmem:[%s839_s1] sm:$0xff]   ;;  %v59_v12 = vld [vmem:[%s840_s2 + $0x18] sm:$0xff] }
   0x6   :  { %553 = vmatpush3.bf16.msra.mxu0 %v604_v1  ;;  %592 = vmatpush3.bf16.msra.mxu1 %v604_v1  ;;  %v613_v10 = vld [vmem:[%s839_s1 + $0x20] sm:$0xff]   ;;  %v609_v15 = vld [vmem:[%s838_s0 + $0x28] sm:$0xff]   ;;  %v363_v17 = vld [vmem:[%s841_s3 + $0x10] sm:$0xff] }
   0x7   :  { %554 = vmatprep.subr.bf16.mxu0 %v605_v2  ;;  %585 = vmatprep.subr.bf16.mxu1 %v605_v2  ;;  %v608_v11 = vld [vmem:[%s838_s0 + $0x20] sm:$0xff]   ;;  %v362_v16 = vld [vmem:[%s841_s3 + $0x8] sm:$0xff]  ;;  %v610_v18 = vld [vmem:[%s838_s0 + $0x30] sm:$0xff]  }
   0x8   :  { %74 = vperm.xlu0 %602, %v56_v5   ;;  %84 = vperm.xlu1 %603, %v58_v8   ;;  %v60_v13 = vld [vmem:[%s840_s2 + $0x20] sm:$0xff]  ;;  %v61_v19 = vld [vmem:[%s840_s2 + $0x28] sm:$0xff]  ;;  %v364_v20 = vld [vmem:[%s841_s3 + $0x18] sm:$0xff] }
   0x9   :  { %568 = vmatprep.mubr.bf16.mxu0 %v612_v9  ;;  %576 = vmatprep.mubr.bf16.mxu1 %v613_v10  ;;  %v361_v14 = vld [vmem:[%s841_s3] sm:$0xff]  ;;  %v611_v21 = vld [vmem:[%s838_s0 + $0x38] sm:$0xff]   ;;  %v62_v22 = vld [vmem:[%s840_s2 + $0x30] sm:$0xff] }
   0xa   :  { %555 = vmatpush3.bf16.msra.mxu0 %v605_v2  ;;  %593 = vmatpush3.bf16.msra.mxu1 %v605_v2  ;;  %v365_v23 = vld [vmem:[%s841_s3 + $0x20] sm:$0xff] }
   0xb   :  { %556 = vmatprep.subr.bf16.mxu0 %v606_v4  ;;  %586 = vmatprep.subr.bf16.mxu1 %v606_v4 }
   0xc   :  { %79 = vperm.xlu0 %602, %v57_v7   ;;  %89 = vperm.xlu1 %603, %v59_v12  }
   0xe   :  { %557 = vmatpush3.bf16.msra.mxu0 %v606_v4  ;;  %594 = vmatpush3.bf16.msra.mxu1 %v606_v4 }
   0xf   :  { %558 = vmatprep.subr.bf16.mxu0 %v607_v6  ;;  %587 = vmatprep.subr.bf16.mxu1 %v607_v6 }
  0x10   :  { %94 = vperm.xlu0 %602, %v60_v13   ;;  %379 = vperm.xlu1 %603, %v361_v14  }
  0x12   :  { %559 = vmatpush3.bf16.msra.mxu0 %v607_v6  ;;  %595 = vmatpush3.bf16.msra.mxu1 %v607_v6 }
  0x13   :  { %560 = vmatprep.subr.bf16.mxu0 %v608_v11  ;;  %588 = vmatprep.subr.bf16.mxu1 %v608_v11 }
  0x14   :  { %384 = vperm.xlu0 %602, %v362_v16   ;;  %389 = vperm.xlu1 %603, %v363_v17  }
  0x16   :  { %561 = vmatpush3.bf16.msra.mxu0 %v608_v11  ;;  %596 = vmatpush3.bf16.msra.mxu1 %v608_v11 }
  0x17   :  { %562 = vmatprep.subr.bf16.mxu0 %v609_v15  ;;  %589 = vmatprep.subr.bf16.mxu1 %v609_v15 }
  0x18   :  { %99 = vperm.xlu0 %602, %v61_v19   ;;  %394 = vperm.xlu1 %603, %v364_v20  }
  0x1a   :  { %563 = vmatpush3.bf16.msra.mxu0 %v609_v15  ;;  %597 = vmatpush3.bf16.msra.mxu1 %v609_v15 }
  0x1b   :  { %564 = vmatprep.subr.bf16.mxu0 %v610_v18  ;;  %590 = vmatprep.subr.bf16.mxu1 %v610_v18 }
  0x1e   :  { %565 = vmatpush3.bf16.msra.mxu0 %v610_v18  ;;  %598 = vmatpush3.bf16.msra.mxu1 %v610_v18 }
  0x1f   :  { %12 = vsyncpa [#allocation4], 0  ;;  %566 = vmatprep.subr.bf16.mxu0 %v611_v21  ;;  %591 = vmatprep.subr.bf16.mxu1 %v611_v21  ;;  %v614_v24 = vld [vmem:[%s839_s1 + $0x8] sm:$0xff]   ;;  %v63_v26 = vld [vmem:[%s840_s2 + $0x38] sm:$0xff] }
  0x20   :  { %104 = vperm.xlu0 %602, %v62_v22   ;;  %v615_v25 = vld [vmem:[%s839_s1 + $0x28] sm:$0xff]   ;;  %399 = vperm.xlu1 %603, %v365_v23   ;;  %v616_v27 = vld [vmem:[%s839_s1 + $0x10] sm:$0xff]   ;;  %v64_v30 = vld [vmem:[%s840_s2 + $0x40] sm:$0xff] }
  0x21   :  { %v617_v28 = vld [vmem:[%s839_s1 + $0x30] sm:$0xff]   ;;  %v366_v29 = vld [vmem:[%s841_s3 + $0x28] sm:$0xff]  ;;  %v618_v32 = vld [vmem:[%s839_s1 + $0x18] sm:$0xff]  }
  0x22   :  { %567 = vmatpush3.bf16.msra.mxu0 %v611_v21  ;;  %599 = vmatpush3.bf16.msra.mxu1 %v611_v21  ;;  %v367_v31 = vld [vmem:[%s841_s3 + $0x30] sm:$0xff]  ;;  %v619_v33 = vld [vmem:[%s839_s1 + $0x38] sm:$0xff]   ;;  %v65_v34 = vld [vmem:[%s840_s2 + $0x48] sm:$0xff] }
  0x23   :  { %v368_v35 = vld [vmem:[%s841_s3 + $0x38] sm:$0xff]  ;;  %v66_v36 = vld [vmem:[%s840_s2 + $0x50] sm:$0xff]  ;;  %v369_v37 = vld [vmem:[%s841_s3 + $0x40] sm:$0xff] }
  0x24   :  { %109 = vperm.xlu0 %602, %v63_v26   ;;  %404 = vperm.xlu1 %603, %v366_v29   ;;  %v67_v38 = vld [vmem:[%s840_s2 + $0x58] sm:$0xff]  ;;  %v370_v39 = vld [vmem:[%s841_s3 + $0x48] sm:$0xff]  ;;  %v68_v40 = vld [vmem:[%s840_s2 + $0x60] sm:$0xff] }
  0x25   :  { %569 = vmatmul.mubr.bf16.vlgmr.msra.gmra.mrb[0].mxu0 %v614_v24  ;;  %577 = vmatmul.mubr.bf16.vlgmr.msra.gmra.mrb[0].mxu1 %v615_v25  ;;  %v371_v41 = vld [vmem:[%s841_s3 + $0x50] sm:$0xff]  ;;  %v69_v42 = vld [vmem:[%s840_s2 + $0x68] sm:$0xff]  ;;  %v372_v43 = vld [vmem:[%s841_s3 + $0x58] sm:$0xff] }
  0x26   :  { %572 = vmatprep.mubr.bf16.mxu0 %v616_v27  ;;  %580 = vmatprep.mubr.bf16.mxu1 %v617_v28  ;;  %v70_v44 = vld [vmem:[%s840_s2 + $0x70] sm:$0xff]  ;;  %v373_v45 = vld [vmem:[%s841_s3 + $0x60] sm:$0xff]  ;;  %v71_v46 = vld [vmem:[%s840_s2 + $0x78] sm:$0xff]  ;;  %s645_s2 = smov [#allocation3]  }
  0x27   :  { %v374_v47 = vld [vmem:[%s841_s3 + $0x68] sm:$0xff]  ;;  %v375_v48 = vld [vmem:[%s841_s3 + $0x70] sm:$0xff]  ;;  %v376_v49 = vld [vmem:[%s841_s3 + $0x78] sm:$0xff]  ;;  %s512_s3 = sshll.u32 %s645_s2, 4  ;;  %s513_s3 = int_to_ptr.vmem [resolvable:$true] %s512_s3 }
  0x28   :  { %114 = vperm.xlu0 %602, %v64_v30   ;;  %409 = vperm.xlu1 %603, %v367_v31   ;;  %v494_v50 = vld [vmem:[#allocation2] sm:$0x1]  ;;  %s620_s9 = scalar_lea.vmem %s513_s3, 16  ;;  %s624_s10 = scalar_lea.vmem %s513_s3, 32 }
  0x29   :  { %p621_p0 = scmp.ne.s32.totalorder %s513_s3, %s620_s9  ;;  %p625_p1 = scmp.lt.s32.totalorder %s513_s3, %s513_s3 }
  0x2a   :  { %p626_p2 = scmp.lt.s32.totalorder %s624_s10, %s620_s9 }
  0x2c   :  { %119 = vperm.xlu0 %602, %v65_v34   ;;  %414 = vperm.xlu1 %603, %v368_v35   ;;  %p627_p3 = por %p626_p2, %p625_p1 }
  0x2d   :  { %573 = vmatmul.mubr.bf16.gmra.mrb[4].mxu0 %v618_v32  ;;  %581 = vmatmul.mubr.bf16.gmra.mrb[4].mxu1 %v619_v33 }
  0x2e   :  { %p628_p4 = pnand %p627_p3, %p621_p0 }
  0x30   :  { %124 = vperm.xlu0 %602, %v66_v36   ;;  %419 = vperm.xlu1 %603, %v369_v37  }
  0x34   :  { %129 = vperm.xlu0 %602, %v67_v38   ;;  %424 = vperm.xlu1 %603, %v370_v39  }
  0x38   :  { %134 = vperm.xlu0 %602, %v68_v40   ;;  %429 = vperm.xlu1 %603, %v371_v41  }
  0x3c   :  { %139 = vperm.xlu0 %602, %v69_v42   ;;  %434 = vperm.xlu1 %603, %v372_v43  }
  0x40   :  { %144 = vperm.xlu0 %602, %v70_v44   ;;  %439 = vperm.xlu1 %603, %v373_v45  }
  0x44   :  { %149 = vperm.xlu0 %602, %v71_v46   ;;  %444 = vperm.xlu1 %603, %v374_v47  }
  0x48   :  { %449 = vperm.xlu0 %602, %v375_v48   ;;  %454 = vperm.xlu1 %603, %v376_v49  }
  0x4c   :  { %497 = vperm.xlu0 %602, %v494_v50  }
  0x87   :  { %v75_v51 = vpop.permute.xlu0 %74  ;;  %v85_v52 = vpop.permute.xlu1 %84 }
  0x8b   :  { %v80_v53 = vpop.permute.xlu0 %79  ;;  %v90_v54 = vpop.permute.xlu1 %89 }
  0x8f   :  { %v95_v55 = vpop.permute.xlu0 %94  ;;  %v380_v56 = vpop.permute.xlu1 %379 }
  0x93   :  { %v385_v57 = vpop.permute.xlu0 %384  ;;  %v390_v58 = vpop.permute.xlu1 %389 }
  0x97   :  { %v100_v59 = vpop.permute.xlu0 %99  ;;  %v395_v60 = vpop.permute.xlu1 %394 }
  0x9f   :  { %v105_v61 = vpop.permute.xlu0 %104  ;;  %v400_v62 = vpop.permute.xlu1 %399 }
  0xa3   :  { %v110_v63 = vpop.permute.xlu0 %109  ;;  %v405_v0 = vpop.permute.xlu1 %404 }
  0xa7   :  { %v115_v1 = vpop.permute.xlu0 %114  ;;  %v410_v2 = vpop.permute.xlu1 %409 }
  0xab   :  { %v120_v3 = vpop.permute.xlu0 %119  ;;  %v415_v4 = vpop.permute.xlu1 %414 }
  0xaf   :  { %v125_v5 = vpop.permute.xlu0 %124  ;;  %v420_v6 = vpop.permute.xlu1 %419 }
  0xb3   :  { %v130_v7 = vpop.permute.xlu0 %129  ;;  %v823_v8 = vpop.permute.xlu1 %424 }
  0xb7   :  { %v135_v24 = vpop.permute.xlu0 %134  ;;  %v430_v25 = vpop.permute.xlu1 %429 }
  0xf8   :  { %v570_v9 = vpop.f32.mrb[0].mxu0  ;;  %v578_v10 = vpop.f32.mrb[0].mxu1 }
  0xf9   :  { %v282_v11 = vpop.f32.mrb[1].mxu0  ;;  %v314_v12 = vpop.f32.mrb[1].mxu1  ;;  %v291_v13 = vadd.f32 %v570_v9, %v85_v52 }
  0xfa   :  { %v283_v14 = vadd.f32 %v282_v11, %v75_v51  ;;  %v571_v15 = vpop.f32.mrb[2].mxu0  ;;  %v579_v16 = vpop.f32.mrb[2].mxu1  ;;  %v315_v46 = vadd.f32 %v314_v12, %v115_v1 }
  0xfb   :  { %v294_v17 = vadd.f32 %v571_v15, %v90_v54  ;;  %v285_v18 = vpop.f32.mrb[3].mxu0  ;;  %v317_v19 = vpop.f32.mrb[3].mxu1  ;;  %v347_v22 = vmax.f32 %v291_v13, 0.0  ;;  %v326_v9 = vadd.f32 %v579_v16, %v130_v7 }
  0xfc   :  { %v345_v20 = vmax.f32 %v283_v14, 0.0  ;;  %v286_v21 = vadd.f32 %v285_v18, %v80_v53  ;;  %v140_v51 = vpop.permute.xlu0 %139  ;;  %v318_v52 = vadd.f32 %v317_v19, %v120_v3 }
  0xfd   :  { %v348_v26 = vmax.f32 %v294_v17, 0.0  ;;  %v459_v33 = vmul.f32 %v390_v58, %v347_v22  ;;  %v353_v58 = vmax.f32 %v315_v46, 0.0  ;;  %v356_v17 = vmax.f32 %v326_v9, 0.0 }
  0xfe   :  { %v346_v23 = vmax.f32 %v286_v21, 0.0  ;;  %v457_v27 = vmul.f32 %v380_v56, %v345_v20  ;;  %v354_v11 = vmax.f32 %v318_v52, 0.0 }
  0xff   :  { %v460_v39 = vmul.f32 %v395_v60, %v348_v26  ;;  %v465_v12 = vmul.f32 %v420_v6, %v353_v58 }
 0x100   :  { %v458_v28 = vmul.f32 %v385_v57, %v346_v23  ;;  %v574_v29 = vpop.f32.mrb[4].mxu0  ;;  %v582_v30 = vpop.f32.mrb[4].mxu1  ;;  %v323_v57 = vadd.f32 %v578_v10, %v125_v5  ;;  %v466_v3 = vmul.f32 %v823_v8, %v354_v11 }
 0x101   :  { %v298_v31 = vpop.f32.mrb[5].mxu0  ;;  %v330_v32 = vpop.f32.mrb[5].mxu1  ;;  %v307_v35 = vadd.f32 %v574_v29, %v105_v61 }
 0x102   :  { %v473_v34 = vadd.f32 %v458_v28, %v457_v27  ;;  %v299_v36 = vadd.f32 %v298_v31, %v95_v55  ;;  %v575_v37 = vpop.f32.mrb[6].mxu0  ;;  %v583_v38 = vpop.f32.mrb[6].mxu1  ;;  %v355_v1 = vmax.f32 %v323_v57, 0.0 }
 0x103   :  { %v301_v40 = vpop.f32.mrb[7].mxu0  ;;  %v333_v41 = vpop.f32.mrb[7].mxu1  ;;  %v310_v44 = vadd.f32 %v575_v37, %v110_v63  ;;  %v351_v47 = vmax.f32 %v307_v35, 0.0 }
 0x104   :  { %v474_v42 = vadd.f32 %v473_v34, %v459_v33  ;;  %v349_v43 = vmax.f32 %v299_v36, 0.0  ;;  %v302_v45 = vadd.f32 %v301_v40, %v100_v59  ;;  %v435_v55 = vpop.permute.xlu1 %434  ;;  %v145_v59 = vpop.permute.xlu0 %144  ;;  %v467_v19 = vmul.f32 %v430_v25, %v355_v1 }
 0x105   :  { %v352_v54 = vmax.f32 %v310_v44, 0.0  ;;  %v463_v60 = vmul.f32 %v410_v2, %v351_v47  ;;  %v339_v5 = vadd.f32 %v582_v30, %v145_v59  ;;  %v468_v7 = vmul.f32 %v435_v55, %v356_v17 }
 0x106   :  { %v461_v48 = vmul.f32 %v400_v62, %v349_v43  ;;  %v475_v49 = vadd.f32 %v474_v42, %v460_v39  ;;  %v350_v50 = vmax.f32 %v302_v45, 0.0  ;;  %v331_v62 = vadd.f32 %v330_v32, %v135_v24 }
 0x107   :  { %v464_v13 = vmul.f32 %v415_v4, %v352_v54  ;;  %v359_v23 = vmax.f32 %v339_v5, 0.0  ;;  %v500_v33 = vlaneseq }
 0x108   :  { %v476_v53 = vadd.f32 %v475_v49, %v461_v48  ;;  %v462_v56 = vmul.f32 %v405_v0, %v350_v50  ;;  %v440_v15 = vpop.permute.xlu1 %439  ;;  %v334_v0 = vadd.f32 %v333_v41, %v140_v51  ;;  %v357_v10 = vmax.f32 %v331_v62, 0.0  ;;  %v150_v20 = vpop.permute.xlu0 %149 }
 0x109   :  { %v342_v16 = vadd.f32 %v583_v38, %v150_v20  ;;  %v501_v36 = vshrl.u32 %v500_v33, 7 }
 0x10a   :  { %v477_v61 = vadd.f32 %v476_v53, %v462_v56  ;;  %v358_v4 = vmax.f32 %v334_v0, 0.0  ;;  %v469_v6 = vmul.f32 %v440_v15, %v357_v10 }
 0x10b   :  { %v360_v26 = vmax.f32 %v342_v16, 0.0  ;;  %v502_v39 = vsub.s32 0, %v501_v36 }
 0x10c   :  { %v478_v63 = vadd.f32 %v477_v61, %v463_v60  ;;  %v445_v22 = vpop.permute.xlu1 %444  ;;  %v450_v29 = vpop.permute.xlu0 %449 }
 0x10d   :  { %v470_v27 = vmul.f32 %v445_v22, %v358_v4  ;;  %v471_v8 = vmul.f32 %v450_v29, %v359_v23 }
 0x10e   :  { %v479_v14 = vadd.f32 %v478_v63, %v464_v13 }
 0x110   :  { %v480_v18 = vadd.f32 %v479_v14, %v465_v12  ;;  %v455_v32 = vpop.permute.xlu1 %454  ;;  %v498_v41 = vpop.permute.xlu0 %497 }
 0x111   :  { %v472_v25 = vmul.f32 %v455_v32, %v360_v26  ;;  %v503_v43 = vrot.slane %v498_v41, %v502_v39 }
 0x112   :  { %v481_v2 = vadd.f32 %v480_v18, %v466_v3 }
 0x114   :  { %v482_v21 = vadd.f32 %v481_v2, %v467_v19 }
 0x116   :  { %v483_v24 = vadd.f32 %v482_v21, %v468_v7 }
 0x118   :  { %v484_v28 = vadd.f32 %v483_v24, %v469_v6 }
 0x11a   :  { %v485_v31 = vadd.f32 %v484_v28, %v470_v27 }
 0x11c   :  { %v486_v30 = vadd.f32 %v485_v31, %v471_v8 }
 0x11e   :  { %v487_v34 = vadd.f32 %v486_v30, %v472_v25 }
 0x120   :  { %v488_v35 = vrot.slane %v487_v34, 4 }
 0x122   :  { %v489_v37 = vadd.f32 %v488_v35, %v487_v34 }
 0x124   :  { %v490_v38 = vrot.slane %v489_v37, 2 }
 0x126   :  { %v491_v40 = vadd.f32 %v490_v38, %v489_v37 }
 0x128   :  { %v492_v42 = vrot.slane %v491_v40, 1 }
 0x12a   :  { %v493_v44 = vadd.f32 %v492_v42, %v491_v40 }
 0x12c   :  { %v504_v45 = vadd.f32 %v503_v43, %v493_v44 }
 0x12e   :  { %505 = vst [vmem:[#allocation3] sm:$0x1] %v504_v45 }
 0x12f   :  { %631 = shalt.err (!%p628_p4)
}
 0x130   :  { %s632_s12 = scalar_lea.hbm %s843_s5, 16 }
 0x131   :  { %p633_p5 = scmp.ne.s32.totalorder %s843_s5, %s632_s12  ;;  %p636_p6 = scmp.lt.u32.totalorder %s632_s12, %s843_s5 }
 0x133   :  { %p638_p7 = pnand %p636_p6, %p633_p5 }
 0x135   :  { %641 = shalt.err (!%p638_p7)
}
 0x136   :  { %515 = dma.vmem_to_hbm [thread:$0]  %s513_s3, 16, %s843_s5, [#allocation4]  }
 0x137   :  { %642 = dma.done.wait [#allocation4], 16  }
 0x138   :  { %643 = vsyncadd [#allocation4], 4294967280 }
 0x139   :  { %519 = vsyncpa [#allocation4], 1 }

</bundles_post_ra>
